<compile_context>
chip_gen: v7x
topology: tpu7x:2x2x1
jax: 0.10.0
libtpu: 0.0.40
codegen_flags: <defaults>
</compile_context>

<pallas_src>
import math

import jax
import jax.numpy as jnp
from jax.experimental import pallas as pl
from jax.experimental.pallas import tpu as pltpu


# ---------------------------------------------------------------------------
# Latitude weights — exact port of _get_lat_weights / _cell_area_from_latitude.
# ---------------------------------------------------------------------------
def get_lat_weights(num_latitudes: int) -> jnp.ndarray:
    lat = jnp.deg2rad(jnp.linspace(-90.0, 90.0, num_latitudes)).astype(jnp.float32)
    half_pi = jnp.asarray([jnp.pi / 2.0], dtype=lat.dtype)
    bounds = jnp.concatenate([-half_pi, (lat[:-1] + lat[1:]) / 2.0, half_pi])
    w = jnp.sin(bounds[1:]) - jnp.sin(bounds[:-1])
    return w / jnp.mean(w)


def _round_up(x: int, m: int) -> int:
    return ((x + m - 1) // m) * m


# ---------------------------------------------------------------------------
# Kernel factory (closes over static shape parameters).
# Refs:
#   w_ref   : (1, S)  f32   lane-periodic latitude-weight row (constant block)
#   t_ref   : (1, TR, S)    truth tile, native dtype
#   f_ref   : (1, TR, S)    forecast tile, native dtype
#   o_ref   : (1, 8, 128)   f32 output tile (rmse broadcast into a full vreg)
#   acc_ref : (8, S)  f32   VMEM partial-sum accumulator (lane+sublane dense)
# ---------------------------------------------------------------------------
def _make_kernel(TR: int, S: int, R: int, denom: float, needs_mask: bool):
    G = TR // 8  # TR is always a multiple of 8

    def kernel(w_ref, t_ref, f_ref, o_ref, acc_ref):
        k = pl.program_id(1)
        last = pl.num_programs(1) - 1

        @pl.when(k == 0)
        def _init():
            acc_ref[...] = jnp.zeros_like(acc_ref)

        # Inputs were DMA'd in their native dtype; upcast in-register.
        d = t_ref[0].astype(jnp.float32) - f_ref[0].astype(jnp.float32)  # (TR, S)
        wse = d * d * w_ref[...]            # (1, S) broadcasts over sublanes

        def accumulate(x):
            # Fold (TR, S) -> (8, S): vreg-aligned VPU adds only (no XLU).
            acc_ref[...] += jnp.sum(x.reshape(G, 8, S), axis=0)

        if needs_mask:
            # Only the final row-block is partial; keep steady-state steps
            # mask-free and pay iota/compare/select on the last step only.
            @pl.when(k != last)
            def _bulk():
                accumulate(wse)

            @pl.when(k == last)
            def _tail():
                rows = k * TR + jax.lax.broadcasted_iota(jnp.int32, (TR, S), 0)
                accumulate(jnp.where(rows < R, wse, 0.0))
        else:
            accumulate(wse)

        @pl.when(k == last)
        def _finalize():
            mse = jnp.sum(acc_ref[...]) * (1.0 / denom)   # one XLU reduce / batch
            rmse = jnp.sqrt(mse)
            o_ref[...] = jnp.broadcast_to(rmse, o_ref.shape).astype(o_ref.dtype)

    return kernel


def weighted_rmse(truth, forecast, weights, *, tile_rows=None):
    """Latitude-weighted RMSE. truth/forecast: (B, C, H, W); returns (B,) f32."""
    B, C, H, W = truth.shape
    N = C * H
    M = N * W
    itemsize = jnp.dtype(truth.dtype).itemsize
    w32 = weights.astype(jnp.float32).reshape(W)

    # Layout selection: contiguous reshape only — never an HBM transpose.
    L = (W * 128) // math.gcd(W, 128)        # lcm(W, 128)
    if M % L == 0:
        S = L                                 # lane-dense rows, periodic weights
        w_row = jnp.tile(w32, S // W).reshape(1, S)
    else:
        S = W                                 # native-layout fallback
        w_row = w32.reshape(1, S)
    R = M // S
    denom = float(M)                          # full C*H*W, independent of tiling

    # Row-tile size from a per-buffer VMEM budget (2 inputs x 2 buffers).
    if tile_rows is None:
        per_buffer_bytes = 2 * 1024 * 1024
        tile_rows = max(8, (per_buffer_bytes // (S * itemsize)) // 8 * 8)
    TR = min(_round_up(R, 8), _round_up(max(int(tile_rows), 8), 8))
    K = pl.cdiv(R, TR)
    needs_mask = (R % TR) != 0

    t = truth.reshape(B, R, S)                # free, contiguous
    f = forecast.reshape(B, R, S)             # free, contiguous

    kernel = _make_kernel(TR, S, R, denom, needs_mask)

    # Scoped-VMEM limit from actual usage (+ headroom for f32 intermediates).
    tile_bytes = TR * S * itemsize
    tile_f32 = TR * S * 4
    vmem_limit = 4 * tile_bytes + 4 * tile_f32 + (8 << 20)
    vmem_limit = int(min(64 << 20, max(24 << 20, vmem_limit)))

    out = pl.pallas_call(
        kernel,
        out_shape=jax.ShapeDtypeStruct((B, 8, 128), jnp.float32),
        grid_spec=pltpu.PrefetchScalarGridSpec(
            num_scalar_prefetch=0,
            grid=(B, K),
            in_specs=[
                pl.BlockSpec((1, S), lambda b, k: (0, 0)),          # weight row
                pl.BlockSpec((1, TR, S), lambda b, k: (b, k, 0)),   # truth tile
                pl.BlockSpec((1, TR, S), lambda b, k: (b, k, 0)),   # forecast
            ],
            out_specs=pl.BlockSpec((1, 8, 128), lambda b, k: (b, 0, 0)),
            scratch_shapes=[pltpu.VMEM((8, S), jnp.float32)],
        ),
        compiler_params=pltpu.CompilerParams(
            dimension_semantics=("parallel", "arbitrary"),
            vmem_limit_bytes=vmem_limit,
        ),
    )(w_row, t, f)
    return out[:, 0, 0]


def weighted_rmse_ref(truth, forecast, weights):
    err = (truth - forecast) ** 2
    err = err * weights                 # broadcasts over the last (latitude) dim
    mse = jnp.mean(err, axis=(1, 2, 3))
    return jnp.sqrt(mse)


if __name__ == "__main__":
    B, C, H, num_latitudes = 2, 4, 16, 16    # W = num_latitudes

    key = jax.random.PRNGKey(0)
    k1, k2 = jax.random.split(key)
    truth = jax.random.normal(k1, (B, C, H, num_latitudes), dtype=jnp.float32)
    forecast = jax.random.normal(k2, (B, C, H, num_latitudes), dtype=jnp.float32)
    weights = get_lat_weights(num_latitudes)

    # 1) f32, fast (lane-periodic) path, single reduction step.
    rmse = jax.block_until_ready(weighted_rmse(truth, forecast, weights))
    ref = weighted_rmse_ref(truth, forecast, weights)
    assert rmse.shape == (B,)
    assert jnp.allclose(rmse, ref, rtol=1e-5, atol=1e-5), (rmse, ref)

    # 2) multi-step reduction with a partial (masked) final row-block.
    C2, H2 = 4, 80                            # R = 40 rows of S = 128
    t2 = jax.random.normal(jax.random.PRNGKey(1), (B, C2, H2, num_latitudes), jnp.float32)
    f2 = jax.random.normal(jax.random.PRNGKey(2), (B, C2, H2, num_latitudes), jnp.float32)
    rmse2 = jax.block_until_ready(weighted_rmse(t2, f2, weights, tile_rows=16))
    ref2 = weighted_rmse_ref(t2, f2, weights)
    assert jnp.allclose(rmse2, ref2, rtol=1e-5, atol=1e-5), (rmse2, ref2)

    # 3) native-dtype (bf16) DMA path; kernel upcasts in-register.
    t_bf = truth.astype(jnp.bfloat16)
    f_bf = forecast.astype(jnp.bfloat16)
    rmse_bf = jax.block_until_ready(weighted_rmse(t_bf, f_bf, weights))
    ref_bf = weighted_rmse_ref(t_bf.astype(jnp.float32),
                               f_bf.astype(jnp.float32), weights)
    assert jnp.allclose(rmse_bf, ref_bf, rtol=1e-4, atol=1e-4), (rmse_bf, ref_bf)

    # 4) fallback path (C*H*W not divisible by lcm(W, 128)): native (N, W) rows.
    W3, C3, H3 = 12, 3, 5
    w3 = get_lat_weights(W3)
    t3 = jax.random.normal(jax.random.PRNGKey(3), (B, C3, H3, W3), jnp.float32)
    f3 = jax.random.normal(jax.random.PRNGKey(4), (B, C3, H3, W3), jnp.float32)
    rmse3 = jax.block_until_ready(weighted_rmse(t3, f3, w3))
    ref3 = weighted_rmse_ref(t3, f3, w3)
    assert jnp.allclose(rmse3, ref3, rtol=1e-5, atol=1e-5), (rmse3, ref3)

    print("KERNEL_OK")
</pallas_src>

<mosaic_0001>
module attributes {stable_mosaic.version = 11 : i64} {
  func.func @kernel(%arg0: i32, %arg1: i32, %arg2: memref<1x128xf32, #tpu.memory_space<vmem>>, %arg3: memref<1x8x128xf32, #tpu.memory_space<vmem>>, %arg4: memref<1x8x128xf32, #tpu.memory_space<vmem>>, %arg5: memref<1x8x128xf32, #tpu.memory_space<vmem>>, %arg6: memref<8x128xf32, #tpu.memory_space<vmem>>) attributes {dimension_semantics = [#tpu.dimension_semantics<parallel>, #tpu.dimension_semantics<arbitrary>], iteration_bounds = array<i64: 2, 1>, scalar_prefetch = 0 : i64, scratch_operands = 1 : i64, tpu.core_type = #tpu.core_type<tc>, window_params = [{pipeline_mode = #tpu.pipeline_mode<synchronous>, transform_indices = @transform_0, window_bounds = array<i64: 1, 128>}, {transform_indices = @transform_1, window_bounds = array<i64: 1, 8, 128>}, {transform_indices = @transform_2, window_bounds = array<i64: 1, 8, 128>}, {transform_indices = @transform_3, window_bounds = array<i64: 1, 8, 128>}]} {
    %c0_i32 = arith.constant 0 : i32
    %0 = arith.cmpi eq, %arg1, %c0_i32 : i32
    %1 = arith.extui %0 : i1 to i32
    %c0_i32_0 = arith.constant 0 : i32
    %2 = arith.cmpi ne, %1, %c0_i32_0 : i32
    scf.if %2 {
      %cst_14 = arith.constant 0.000000e+00 : f32
      %20 = vector.broadcast %cst_14 : f32 to vector<8x128xf32>
      %c0_15 = arith.constant 0 : index
      %c0_16 = arith.constant 0 : index
      %21 = vector.load %arg6[%c0_15, %c0_16] : memref<8x128xf32, #tpu.memory_space<vmem>>, vector<8x128xf32>
      tpu.vector_store %arg6[%c0_15, %c0_16], %20 {strides = array<i32>} : memref<8x128xf32, #tpu.memory_space<vmem>>, vector<8x128xf32>,
    } else {
    }
    %c0 = arith.constant 0 : index
    %c0_1 = arith.constant 0 : index
    %c0_2 = arith.constant 0 : index
    %3 = vector.load %arg3[%c0, %c0_1, %c0_2] : memref<1x8x128xf32, #tpu.memory_space<vmem>>, vector<1x8x128xf32>
    %4 = vector.shape_cast %3 : vector<1x8x128xf32> to vector<8x128xf32>
    %c0_3 = arith.constant 0 : index
    %c0_4 = arith.constant 0 : index
    %c0_5 = arith.constant 0 : index
    %5 = vector.load %arg4[%c0_3, %c0_4, %c0_5] : memref<1x8x128xf32, #tpu.memory_space<vmem>>, vector<1x8x128xf32>
    %6 = vector.shape_cast %5 : vector<1x8x128xf32> to vector<8x128xf32>
    %7 = arith.subf %4, %6 : vector<8x128xf32>
    %8 = arith.mulf %7, %7 : vector<8x128xf32>
    %c0_6 = arith.constant 0 : index
    %c0_7 = arith.constant 0 : index
    %9 = vector.load %arg2[%c0_6, %c0_7] : memref<1x128xf32, #tpu.memory_space<vmem>>, vector<1x128xf32>
    %10 = vector.broadcast %9 : vector<1x128xf32> to vector<8x128xf32>
    %11 = arith.mulf %8, %10 : vector<8x128xf32>
    %c0_8 = arith.constant 0 : index
    %c0_9 = arith.constant 0 : index
    %12 = vector.load %arg6[%c0_8, %c0_9] : memref<8x128xf32, #tpu.memory_space<vmem>>, vector<8x128xf32>
    %13 = vector.shape_cast %11 : vector<8x128xf32> to vector<1x8x128xf32>
    %cst = arith.constant dense<0.000000e+00> : vector<8x128xf32>
    %14 = vector.multi_reduction <add>, %13, %cst [0] : vector<1x8x128xf32> to vector<8x128xf32>
    %15 = arith.addf %12, %14 : vector<8x128xf32>
    %c0_10 = arith.constant 0 : index
    %c0_11 = arith.constant 0 : index
    %16 = vector.load %arg6[%c0_10, %c0_11] : memref<8x128xf32, #tpu.memory_space<vmem>>, vector<8x128xf32>
    tpu.vector_store %arg6[%c0_10, %c0_11], %15 {strides = array<i32>} : memref<8x128xf32, #tpu.memory_space<vmem>>, vector<8x128xf32>,
    %c0_i32_12 = arith.constant 0 : i32
    %17 = arith.cmpi eq, %arg1, %c0_i32_12 : i32
    %18 = arith.extui %17 : i1 to i32
    %c0_i32_13 = arith.constant 0 : i32
    %19 = arith.cmpi ne, %18, %c0_i32_13 : i32
    scf.if %19 {
      %c0_14 = arith.constant 0 : index
      %c0_15 = arith.constant 0 : index
      %20 = vector.load %arg6[%c0_14, %c0_15] : memref<8x128xf32, #tpu.memory_space<vmem>>, vector<8x128xf32>
      %21 = vector.shape_cast %20 : vector<8x128xf32> to vector<1x8x128xf32>
      %cst_16 = arith.constant dense<0.000000e+00> : vector<1xf32>
      %22 = vector.multi_reduction <add>, %21, %cst_16 [1, 2] : vector<1x8x128xf32> to vector<1xf32>
      %23 = vector.shape_cast %22 : vector<1xf32> to vector<1x1x1xf32>
      %24 = vector.extract %23[0, 0, 0] : f32 from vector<1x1x1xf32>
      %cst_17 = arith.constant 9.765625E-4 : f32
      %25 = arith.mulf %24, %cst_17 : f32
      %26 = math.sqrt %25 : f32
      %27 = vector.broadcast %26 : f32 to vector<1x8x128xf32>
      %c0_18 = arith.constant 0 : index
      %c0_19 = arith.constant 0 : index
      %c0_20 = arith.constant 0 : index
      %28 = vector.load %arg5[%c0_18, %c0_19, %c0_20] : memref<1x8x128xf32, #tpu.memory_space<vmem>>, vector<1x8x128xf32>
      tpu.vector_store %arg5[%c0_18, %c0_19, %c0_20], %27 {strides = array<i32>} : memref<1x8x128xf32, #tpu.memory_space<vmem>>, vector<1x8x128xf32>,
    } else {
    }
    return
  }
  func.func @transform_0(%arg0: i32, %arg1: i32) -> (i32, i32) {
    %c0_i32 = arith.constant 0 : i32
    %c0_i32_0 = arith.constant 0 : i32
    %c0_i32_1 = arith.constant 0 : i32
    return %c0_i32, %c0_i32_0 : i32, i32
  }
  func.func @transform_1(%arg0: i32, %arg1: i32) -> (i32, i32, i32) {
    %c0_i32 = arith.constant 0 : i32
    %c0_i32_0 = arith.constant 0 : i32
    return %arg0, %arg1, %c0_i32 : i32, i32, i32
  }
  func.func @transform_2(%arg0: i32, %arg1: i32) -> (i32, i32, i32) {
    %c0_i32 = arith.constant 0 : i32
    %c0_i32_0 = arith.constant 0 : i32
    return %arg0, %arg1, %c0_i32 : i32, i32, i32
  }
  func.func @transform_3(%arg0: i32, %arg1: i32) -> (i32, i32, i32) {
    %c0_i32 = arith.constant 0 : i32
    %c0_i32_0 = arith.constant 0 : i32
    %c0_i32_1 = arith.constant 0 : i32
    return %arg0, %c0_i32, %c0_i32_0 : i32, i32, i32
  }
}

</mosaic_0001>

<bundles_post_ra>
// kernel: tpu_custom_call.1
= control target key start
LH: loop header
LB: loop body
LE: loop exit
PB: predicated region body
PF: predicated region fallthrough
CT: control target
= control target key end

     0   :  { %8 = vsyncpa [#allocation4], 0  ;;  %s982_s0 = inlined_call_operand.hbm [shape: f32[1,128], index: 0, kind: input, shape index: {}]   ;;  %s983_s1 = inlined_call_operand.hbm [shape: f32[2,8,128], index: 1, kind: input, shape index: {}]   ;;  %s984_s2 = inlined_call_operand.hbm [shape: f32[2,8,128], index: 2, kind: input, shape index: {}]   ;;  %s985_s3 = inlined_call_operand.hbm [shape: f32[2,8,128], index: 3, kind: output, shape index: {}]  }
   0x1   :  { %9 = vsyncpa [#allocation7], 0 }
   0x2   :  { %11 = vsyncpa [#allocation7 + $0x1], 0 }
   0x3   :  { %12 = vsyncpa [#allocation5], 0 }
   0x4   :  { %14 = vsyncpa [#allocation5 + $0x1], 0  ;;  %s726_s12 = smov 0   ;;  %s728_s13 = smov 0  }
   0x5   :  { %s730_s14 = smov 0   ;;  %s732_s15 = smov 0  }
   0x6   :  { %s734_s16 = smov 0   ;;  %s736_s17 = smov 0  }
   0x7 LB: > { %s32_s18 = sadd.s32 1, %s696_s16  ;;  %s62_s19 = sadd.s32 1, %s688_s14  ;;  %s700_s17 = sphi %s736_s17, %s20_s17   ;;  %s696_s16 = sphi %s734_s16, %s1011_s16   ;;  %s692_s15 = sphi %s732_s15, %s1010_s15   ;;  %s688_s14 = sphi %s730_s14, %s1009_s14   ;;  %s684_s13 = sphi %s728_s13, %s1008_s13   ;;  %s680_s12 = sphi %s726_s12, %s1007_s12  }
   0x8   : > { %p34_p0 = scmp.ge.s32.totalorder %s32_s18, 2  ;;  %p69_p1 = scmp.ne.s32.totalorder %s688_s14, %s684_s13 }
   0x9   : > { %p70_p2 = scmp.eq.s32.totalorder %s700_s17, 0  ;;  %p472_p5 = scmp.lt.s32.totalorder %s700_s17, 2 }
   0xa   : > { %s1013_s18 = smov (%p34_p0, %s32_s18), 0  ;;  %s164_s21 = sand.u32 1, %s700_s17  }
   0xb   : > { %p71_p4 = por %p70_p2, %p69_p1  ;;  %s57_s20 = ssub.s32 %s696_s16, %s1013_s18 }
   0xc   : > { %p60_p6 = scmp.eq.s32.totalorder %s57_s20, 0  ;;  %s166_s22 = sand.u32 1, %s688_s14  }
   0xd   : > { %s429_s23 = sshll.u32 %s696_s16, 7  ;;  %s776_s25 = sshll.u32 %s166_s22, 3 }
   0xe   : > { %s774_s24 = scalar_select %p60_p6, %s688_s14, %s62_s19  }
   0xf   : > { %s783_s28 = scalar_lea.hbm %s983_s1, %s429_s23  ;;  %p785_p7 = pnand %p472_p5, %p71_p4 }
  0x10   : > { %s168_s30 = scalar_lea.vmem [#allocation6], %s776_s25  ;;  %s792_s5 = scalar_lea.sflag [#allocation7], %s164_s21 }
  0x11   : > { %s176_s4 = sshll.u32 %s168_s30, 4  ;;  %s526_s6 = scalar_lea.hbm %s783_s28, 128  ;;  %s790_s4 = int_to_ptr.vmem [resolvable:$true] %s176_s4 }
  0x12   : > { %p527_p8 = scmp.ne.s32.totalorder %s783_s28, %s526_s6  ;;  %p528_p9 = pneg %p785_p7 }
  0x13   : > { %s531_s9 = scalar_lea.hbm %s983_s1, 256  ;;  %p532_p12 = scmp.lt.u32.totalorder %s783_s28, %s983_s1 }
  0x14   : > { %p529_p10 = pnand %p528_p9, %p527_p8  ;;  %p533_p13 = scmp.lt.u32.totalorder %s531_s9, %s526_s6 }
  0x15   : > { %p535_p2 = scmp.lt.u32.totalorder %s526_s6, %s783_s28 }
  0x16   : > { %p530_p11 = pneg %p529_p10  ;;  %p534_p0 = por %p533_p13, %p532_p12 }
  0x18   : > { %p536_p4 = por %p535_p2, %p534_p0 }
  0x1a   : > { %p537_p5 = pnand %p536_p4, %p530_p11 }
  0x1c   : > { %540 = shalt.err (!%p537_p5)
}
  0x1d   : > { %s541_s19 = scalar_lea.vmem %s790_s4, 128  ;;  %s702_s20 = smov [#allocation6]  }
  0x1e   : > { %p542_p6 = scmp.ne.s32.totalorder %s790_s4, %s541_s19  ;;  %s546_s21 = sshll.u32 %s702_s20, 4  ;;  %s547_s21 = int_to_ptr.vmem [resolvable:$false] %s546_s21 }
  0x1f   : > { %s548_s22 = scalar_lea.vmem %s547_s21, 256  ;;  %p549_p3 = scmp.lt.s32.totalorder %s790_s4, %s547_s21 }
  0x20   : > { %p544_p8 = pnand %p542_p6, %p528_p9  ;;  %p550_p12 = scmp.lt.s32.totalorder %s548_s22, %s541_s19 }
  0x22   : > { %p545_p10 = pneg %p544_p8  ;;  %p551_p13 = por %p550_p12, %p549_p3 }
  0x24   : > { %p552_p0 = pnand %p551_p13, %p545_p10 }
  0x26   : > { %555 = shalt.err (!%p552_p0)
}
  0x27   : > { %463 = dma.hbm_to_vmem [thread:$0]  (!%p785_p7), %s783_s28, 128, %s790_s4, %s792_s5  }
  0x28   : > { %s821_s26 = sadd.s32 4294967295, %s700_s17   ;;  %s424_s27 = sadd.s32 4294967294, %s700_s17  }
  0x29   : > { %p75_p3 = scmp.ne.s32.totalorder %s684_s13, %s680_s12  ;;  %p986_p11 = scmp.eq.s32.totalorder %s821_s26, 0 }
  0x2a   : > { %p127_p2 = scmp.eq.s32.totalorder %s821_s26, 1  ;;  %p133_p4 = scmp.eq.s32.totalorder %s424_s27, 1 }
  0x2b   : > { %p425_p5 = scmp.ge.s32.totalorder %s700_s17, 1  ;;  %p831_p6 = por %p986_p11, %p75_p3 }
  0x2c   : > { %p838_p8 = por %p127_p2, %p69_p1  ;;  %p842_p10 = por %p133_p4, %p75_p3 }
  0x2d   : > { %s992_s30 = scalar_select %p831_p6, 1, 0 }
  0x2e   : > { %s993_s28 = scalar_select %p838_p8, 1, 0 }
  0x2f   : > { %s994_s4 = scalar_select %p842_p10, 1, 0 }
  0x30   : > { %p140_p12 = scmp.lt.s32.totalorder %s700_s17, 3  ;;  %s852_s8 = scalar_lea.hbm %s984_s2, %s429_s23 }
  0x31   : > { %s703_s10 = smov [#allocation3]   ;;  %s187_s19 = scalar_lea.vmem [#allocation8], %s776_s25 }
  0x32   : > { %p854_p13 = pnand %p425_p5, %p140_p12  ;;  %s858_s11 = sshll.u32 %s703_s10, 4  ;;  %s154_s11 = int_to_ptr.vmem [resolvable:$true] %s858_s11 }
  0x33   : > { %s195_s20 = sshll.u32 %s187_s19, 4  ;;  %s556_s21 = scalar_lea.hbm %s852_s8, 128  ;;  %s196_s20 = int_to_ptr.vmem [resolvable:$true] %s195_s20 }
  0x34   : > { %s995_s9 = scalar_select %p854_p13, 1, 0 }
  0x35   : > { %p557_p0 = scmp.ne.s32.totalorder %s852_s8, %s556_s21  ;;  %s561_s27 = scalar_lea.hbm %s984_s2, 256 }
  0x36   : > { %p562_p4 = scmp.lt.u32.totalorder %s852_s8, %s984_s2  ;;  %p563_p5 = scmp.lt.u32.totalorder %s561_s27, %s556_s21 }
  0x37   : > { %p559_p3 = pnand %p557_p0, %p528_p9  ;;  %p565_p11 = scmp.lt.u32.totalorder %s556_s21, %s852_s8 }
  0x38   : > { %p564_p12 = por %p563_p5, %p562_p4 }
  0x39   : > { %p560_p2 = pneg %p559_p3 }
  0x3a   : > { %p566_p10 = por %p565_p11, %p564_p12 }
  0x3c   : > { %p567_p1 = pnand %p566_p10, %p560_p2 }
  0x3e   : > { %570 = shalt.err (!%p567_p1)
}
  0x3f   : > { %s571_s25 = scalar_lea.vmem %s196_s20, 128  ;;  %s704_s10 = smov [#allocation8]  }
  0x40   : > { %p572_p8 = scmp.ne.s32.totalorder %s196_s20, %s571_s25  ;;  %s576_s19 = sshll.u32 %s704_s10, 4  ;;  %s577_s19 = int_to_ptr.vmem [resolvable:$false] %s576_s19 }
  0x41   : > { %s578_s23 = scalar_lea.vmem %s577_s19, 256  ;;  %p579_p6 = scmp.lt.s32.totalorder %s196_s20, %s577_s19 }
  0x42   : > { %p574_p0 = pnand %p572_p8, %p528_p9  ;;  %p580_p13 = scmp.lt.s32.totalorder %s578_s23, %s571_s25 }
  0x44   : > { %p575_p3 = pneg %p574_p0  ;;  %p581_p4 = por %p580_p13, %p579_p6 }
  0x46   : > { %p582_p5 = pnand %p581_p4, %p575_p3 }
  0x48   : > { %585 = shalt.err (!%p582_p5)
}
  0x49   : > { %466 = dma.hbm_to_vmem [thread:$0]  (!%p785_p7), %s852_s8, 128, %s196_s20, %s792_s5  }
  0x4a   : > { %p996_p9 = scmp.eq.s32.totalorder %s821_s26, 0  ;;  %p997_p11 = scmp.ne.s32.totalorder %s995_s9, 0 }
  0x4b   : > { %s586_s6 = scalar_lea.hbm %s982_s0, 16 }
  0x4c   : > { %p998_p8 = pneg %p997_p11  ;;  %p587_p6 = scmp.ne.s32.totalorder %s982_s0, %s586_s6 }
  0x4d   : > { %p593_p2 = scmp.lt.u32.totalorder %s586_s6, %s982_s0 }
  0x4e   : > { %p889_p10 = pnand %p998_p8, %p996_p9 }
  0x50   : > { %p588_p13 = pneg %p889_p10 }
  0x52   : > { %p589_p7 = pnand %p588_p13, %p587_p6 }
  0x54   : > { %p590_p1 = pneg %p589_p7 }
  0x56   : > { %p595_p12 = pnand %p593_p2, %p590_p1 }
  0x58   : > { %598 = shalt.err (!%p595_p12)
}
  0x59   : > { %s599_s20 = scalar_lea.vmem %s154_s11, 16  ;;  %s606_s25 = scalar_lea.vmem %s154_s11, 32 }
  0x5a   : > { %p600_p0 = scmp.ne.s32.totalorder %s154_s11, %s599_s20  ;;  %p607_p5 = scmp.lt.s32.totalorder %s154_s11, %s154_s11 }
  0x5b   : > { %p608_p9 = scmp.lt.s32.totalorder %s606_s25, %s599_s20 }
  0x5c   : > { %p602_p3 = pnand %p600_p0, %p588_p13 }
  0x5d   : > { %p609_p8 = por %p608_p9, %p607_p5 }
  0x5e   : > { %p603_p4 = pneg %p602_p3 }
  0x60   : > { %p610_p11 = pnand %p609_p8, %p603_p4 }
  0x62   : > { %613 = shalt.err (!%p610_p11)
}
  0x63   : > { %459 = dma.hbm_to_vmem [thread:$0]  (!%p889_p10), %s982_s0, 16, %s154_s11, [#allocation4]  }
  0x64   : > { %p1000_p6 = scmp.ne.s32.totalorder %s995_s9, 0 }
  0x65   : > { %p1001_p7 = scmp.eq.s32.totalorder (!%p1000_p6), %s821_s26, 0 }
  0x66   : > { %204 = sbr.rel (%p1000_p6) target bundleno = 410 (0x19a), region = 32 }
  0x6d   : > { %667 = dma.done.wait (%p1001_p7), [#allocation4], 16   ;;  %p1002_p13 = pmov %p1001_p7 }
  0x6e   : > { %s210_s23 = sand.u32 1, %s821_s26   ;;  %s212_s22 = sand.u32 1, %s684_s13  }
  0x6f   : > { %669 = vsyncadd (%p1002_p13), [#allocation4], 4294967280  ;;  %s919_s21 = sshll.u32 %s212_s22, 3  ;;  %s211_s11 = scalar_lea.sflag [#allocation7], %s210_s23 }
  0x70   : > { %s214_s27 = scalar_lea.vmem [#allocation6], %s919_s21  ;;  %p1003_p11 = scmp.ne.s32.totalorder %s992_s30, 0 }
  0x72   : > { %671 = dma.done.wait (%p1003_p11), %s211_s11, 256  }
  0x73   : > { %673 = vsyncadd (%p1003_p11), %s211_s11, 4294967040  ;;  %v256_v0 = vld [vmem:[%s214_s27] sm:$0xff]  ;;  %s223_s9 = scalar_lea.vmem [#allocation8], %s919_s21  ;;  %v437_v3 = vld [vmem:[#allocation3] ss:$0 sm:$0xff]  ;;  %s250_s6 = scalar_lea.vmem [#allocation9], %s919_s21 }
  0x74   : > { %v257_v1 = vld [vmem:[%s223_s9] sm:$0xff]  ;;  %s311_s29 = sshll.u32 %s250_s6, 4  ;;  %s439_s7 = sshll.u32 %s692_s15, 7  ;;  %s929_s29 = int_to_ptr.vmem [resolvable:$true] %s311_s29 }
  0x75   : > { %v258_v2 = vsub.f32 %v256_v0, %v257_v1  ;;  %s934_s25 = scalar_lea.hbm %s985_s3, %s439_s7  ;;  %s298_s10 = scalar_lea.sflag [#allocation5], %s212_s22 }
  0x76   : > { %s614_s19 = scalar_lea.vmem %s929_s29, 128  ;;  %p1004_p1 = scmp.ne.s32.totalorder %s993_s28, 0 }
  0x77   : > { %v259_v4 = vmul.f32 %v258_v2, %v258_v2  ;;  %p615_p10 = scmp.ne.s32.totalorder %s929_s29, %s614_s19  ;;  %s705_s15 = smov [#allocation9]  }
  0x78   : > { %s618_s23 = sshll.u32 %s705_s15, 4  ;;  %s619_s23 = int_to_ptr.vmem [resolvable:$false] %s618_s23 }
  0x79   : > { %v267_v5 = vmul.f32 %v437_v3, %v259_v4  ;;  %p616_p2 = pnand %p615_p10, %p1004_p1  ;;  %s620_s21 = scalar_lea.vmem %s619_s23, 256 }
  0x7a   : > { %p621_p0 = scmp.lt.s32.totalorder %s929_s29, %s619_s23  ;;  %p622_p3 = scmp.lt.s32.totalorder %s620_s21, %s614_s19 }
  0x7b   : > { %276 = vadd.xlane.f32.xlu0 %v267_v5  ;;  %p617_p12 = pneg %p616_p2 }
  0x7c   : > { %p623_p4 = por %p622_p3, %p621_p0 }
  0x7e   : > { %p624_p5 = pnand %p623_p4, %p617_p12 }
 0x108   : > { %v277_v6 = vpop.xlane.xlu0 %276 }
 0x109   : > { %v278_v7 = vrot.slane %v277_v6, 4 }
 0x10b   : > { %v279_v8 = vadd.f32 %v278_v7, %v277_v6 }
 0x10d   : > { %v280_v9 = vrot.slane %v279_v8, 2 }
 0x10f   : > { %v281_v10 = vadd.f32 %v280_v9, %v279_v8 }
 0x111   : > { %v282_v11 = vrot.slane %v281_v10, 1 }
 0x113   : > { %v283_v12 = vadd.f32 %v282_v11, %v281_v10 }
 0x115   : > { %442 = vpush %v283_v12 }
 0x146   : > { %s443_s26 = spop %442 }
 0x147   : > { %s285_s30 = smul.f32 0.0009765625, %s443_s26 }
 0x149   : > { %v286_v13 = vstv %s285_s30 }
 0x14a   : > { %524 = vrsqrt.f32 %v286_v13  ;;  %vm289_vm0 = vcmp.eq.f32.partialorder %v286_v13, inf  ;;  %v292_v16 = vand.u32 2147483648, %v286_v13  ;;  %vm291_vm1 = vcmp.eq.f32.partialorder %v286_v13, 0.0 }
 0x154   : > { %v525_v14 = vpop.eup %524 }
 0x155   : > { %v288_v15 = vmul.f32 %v525_v14, %v286_v13 }
 0x157   : > { %v290_v17 = vsel %vm289_vm0, %v286_v13, %v288_v15 }
 0x158   : > { %v293_v18 = vsel %vm291_vm1, %v292_v16, %v290_v17 }
 0x159   : > { %444 = vpush %v293_v18 }
 0x18a   : > { %s445_s5 = spop %444 }
 0x18b   : > { %v295_v19 = vstv %s445_s5 }
 0x18c   : > { %296 = vst [vmem:[%s250_s6] sm:$0xff] %v295_v19 }
 0x18d   : > { %627 = shalt.err (!%p624_p5)
}
 0x18e   : > { %s628_s22 = scalar_lea.hbm %s934_s25, 128  ;;  %s632_s9 = scalar_lea.hbm %s985_s3, 256 }
 0x18f   : > { %p629_p9 = scmp.ne.s32.totalorder %s934_s25, %s628_s22  ;;  %p633_p7 = scmp.lt.u32.totalorder %s934_s25, %s985_s3 }
 0x190   : > { %p634_p13 = scmp.lt.u32.totalorder %s632_s9, %s628_s22  ;;  %p636_p10 = scmp.lt.u32.totalorder %s628_s22, %s934_s25 }
 0x191   : > { %p630_p8 = pnand %p629_p9, %p1004_p1 }
 0x192   : > { %p635_p11 = por %p634_p13, %p633_p7 }
 0x193   : > { %p631_p6 = pneg %p630_p8 }
 0x194   : > { %p637_p2 = por %p636_p10, %p635_p11 }
 0x196   : > { %p638_p12 = pnand %p637_p2, %p631_p6 }
 0x198   : > { %641 = shalt.err (!%p638_p12)
}
 0x199   : > { %454 = dma.vmem_to_hbm [thread:$0]  (%p1004_p1), %s929_s29, 128, %s934_s25, %s298_s10  }
 0x19a PF: > { %s323_s6 = sand.u32 1, %s680_s12   ;;  %p1005_p0 = scmp.ne.s32.totalorder %s994_s4, 0 }
 0x19b   : > { %p1006_p3 = scmp.ge.s32.totalorder %s700_s17, 2  ;;  %s324_s7 = scalar_lea.sflag [#allocation5], %s323_s6 }
 0x19d   : > { %p468_p4 = pnand %p1006_p3, %p1005_p0 }
 0x19f   : > { %675 = dma.done.wait (!%p468_p4), %s324_s7, 128  }
 0x1a0   : > { %677 = vsyncadd (!%p468_p4), %s324_s7, 4294967168  ;;  %s20_s17 = sadd.s32 1, %s700_s17   ;;  %s1007_s12 = smov %s684_s13 }
 0x1a1   : > { %p17_p5 = scmp.ge.s32.totalorder %s20_s17, 4   ;;  %s1008_s13 = smov %s688_s14 }
 0x1a2   : > { %s1009_s14 = smov %s774_s24  ;;  %s1010_s15 = smov %s696_s16 }
 0x1a3   : > { %s1011_s16 = smov %s1013_s18  ;;  %19 = sbr.rel (!%p17_p5) target bundleno = 7 (0x7), region = 101 }
 0x1aa   :  { %329 = vsyncpa [#allocation4], 1 }
 0x1ab   :  { %331 = vsyncpa [#allocation4 + $0x1], 1 }
 0x1ac   :  { %332 = vsyncpa [#allocation7], 1 }
 0x1ad   :  { %334 = vsyncpa [#allocation7 + $0x1], 1 }
 0x1ae   :  { %335 = vsyncpa [#allocation5], 1 }
 0x1af   :  { %337 = vsyncpa [#allocation5 + $0x1], 1 }

</bundles_post_ra>
